<compile_context>
chip_gen: v6e
topology: v6e:2x2x1
jax: 0.10.0
libtpu: 0.0.40
codegen_flags: <defaults>
</compile_context>

<pallas_src>
import functools

import jax
import jax.numpy as jnp
from jax.experimental import pallas as pl
from jax.experimental.pallas import tpu as pltpu


def _round_up(value, multiple):
    return ((value + multiple - 1) // multiple) * multiple


def _bernoulli_gate_kernel(x_ref, w_ref, b_ref, logits_ref, probs_ref, *,
                           num_out, scalar_bias):
    # x_ref:      (tm, D)        token tile (tokens on sublanes, features on lanes)
    # w_ref:      (OUTP, D)      weight, rows zero-padded up to a multiple of 8
    # b_ref:      (1,) in SMEM   (out_features == 1)  or  (OUT, 1) in VMEM
    # logits_ref: (OUT, tm)      lane-dense output tile (tokens on lanes)
    # probs_ref:  (OUT, tm)
    acc = jnp.einsum(
        "od,td->ot", w_ref[...], x_ref[...],
        preferred_element_type=jnp.float32)                # (OUTP, tm) f32 on MXU
    acc = acc[:num_out, :]                                 # drop zero-padded rows
    if scalar_bias:
        logits = acc + b_ref[0]                            # scalar bias from SMEM
    else:
        logits = acc + b_ref[...].astype(jnp.float32)      # (OUT, 1) lane-broadcast
    logits_ref[...] = logits
    probs_ref[...] = jax.nn.sigmoid(logits)                # EUP, f32


@functools.partial(jax.jit, static_argnames=("tm",))
def bernoulli_gate(x, weight, bias, *, tm=512):
    """Pallas implementation of BernoulliGate.forward.

    Args:
      x:      [B, T, D] word representations.
      weight: [out_features, D]  (PyTorch nn.Linear layout).
      bias:   [out_features].
      tm:     requested token tile size (rounded to a multiple of 128).

    Returns:
      (logits, probs): parameters of the Bernoulli distribution the PyTorch
      module returns, each [B, T, out_features], float32.
    """
    B, T, D = x.shape
    out_features = weight.shape[0]
    BT = B * T
    itemsize = jnp.dtype(x.dtype).itemsize

    # --- token tile choice -------------------------------------------------
    # Multiple of 128 so the (OUT, tm) output blocks are lane-dense and the
    # x blocks satisfy sublane tiling for both f32 (8) and bf16 (16).
    tm_eff = max(128, (int(tm) // 128) * 128)
    # Keep the double-buffered x tile within a conservative VMEM budget
    # (sized against v7x's 64 MiB physical VMEM; v5e/v6e have 128 MiB).
    x_tile_budget = 32 * 1024 * 1024
    while tm_eff > 128 and 2 * tm_eff * D * itemsize > x_tile_budget:
        tm_eff -= 128
    tm_eff = min(tm_eff, _round_up(BT, 128))

    BT_pad = _round_up(BT, tm_eff)
    grid = (BT_pad // tm_eff,)

    # --- operands ------------------------------------------------------------
    x2d = x.reshape(BT, D)
    if BT_pad != BT:
        x2d = jnp.pad(x2d, ((0, BT_pad - BT), (0, 0)))

    # Pad weight rows to a multiple of 8 (MXU sublane tile); padded rows are
    # zero and sliced away inside the kernel.
    outp = _round_up(out_features, 8)
    w = weight.astype(x.dtype)
    if outp != out_features:
        w = jnp.pad(w, ((0, outp - out_features), (0, 0)))

    scalar_bias = out_features == 1
    if scalar_bias:
        b_arr = bias.astype(jnp.float32).reshape(1)
        b_spec = pl.BlockSpec(memory_space=pltpu.MemorySpace.SMEM)
    else:
        b_arr = bias.astype(jnp.float32).reshape(out_features, 1)
        b_spec = pl.BlockSpec((out_features, 1), lambda i: (0, 0))

    kernel = functools.partial(
        _bernoulli_gate_kernel, num_out=out_features, scalar_bias=scalar_bias)

    # Rough per-step VMEM need: double-buffered x tile + resident weight +
    # two double-buffered f32 output tiles, plus slack.
    vmem_est = (2 * tm_eff * D * itemsize
                + 2 * outp * D * itemsize
                + 2 * 2 * out_features * tm_eff * 4
                + (2 << 20))
    vmem_limit = int(min(56 * 1024 * 1024, max(vmem_est, 16 * 1024 * 1024)))

    logits_t, probs_t = pl.pallas_call(
        kernel,
        out_shape=(
            jax.ShapeDtypeStruct((out_features, BT_pad), jnp.float32),
            jax.ShapeDtypeStruct((out_features, BT_pad), jnp.float32),
        ),
        grid_spec=pltpu.PrefetchScalarGridSpec(
            num_scalar_prefetch=0,
            grid=grid,
            in_specs=[
                pl.BlockSpec((tm_eff, D), lambda i: (i, 0)),   # x token tile
                pl.BlockSpec((outp, D), lambda i: (0, 0)),     # full (padded) W
                b_spec,                                        # bias
            ],
            out_specs=(
                pl.BlockSpec((out_features, tm_eff), lambda i: (0, i)),
                pl.BlockSpec((out_features, tm_eff), lambda i: (0, i)),
            ),
        ),
        compiler_params=pltpu.CompilerParams(
            dimension_semantics=("parallel",),   # shards the grid across v7x's 2 TCs
            vmem_limit_bytes=vmem_limit,
        ),
    )(x2d, w, b_arr)

    # Layout plumbing back to the PyTorch convention [B, T, out_features].
    logits = logits_t[:, :BT].T.reshape(B, T, out_features)
    probs = probs_t[:, :BT].T.reshape(B, T, out_features)
    return logits, probs


if __name__ == "__main__":
    key = jax.random.PRNGKey(0)

    def run_case(B, T, D, out_features, tm):
        kcase = jax.random.fold_in(key, B * T * D + out_features)
        kx, kw, kb = jax.random.split(kcase, 3)
        x = jax.random.normal(kx, (B, T, D), dtype=jnp.float32)
        # torch.nn.Linear-style uniform(-1/sqrt(D), 1/sqrt(D)) init.
        bound = 1.0 / jnp.sqrt(jnp.float32(D))
        weight = jax.random.uniform(kw, (out_features, D), jnp.float32, -bound, bound)
        bias = jax.random.uniform(kb, (out_features,), jnp.float32, -bound, bound)

        logits, probs = bernoulli_gate(x, weight, bias, tm=tm)
        jax.block_until_ready((logits, probs))

        # Pure-JAX reference (the Linear + sigmoid the Bernoulli dist holds).
        ref_logits = jnp.einsum("btd,od->bto", x, weight,
                                precision=jax.lax.Precision.HIGHEST) + bias
        ref_probs = jax.nn.sigmoid(ref_logits)
        assert logits.shape == (B, T, out_features)
        assert probs.shape == (B, T, out_features)
        assert jnp.allclose(logits, ref_logits, atol=1e-4, rtol=1e-4)
        assert jnp.allclose(probs, ref_probs, atol=1e-4, rtol=1e-4)

    # Small shapes consistent with the module: x [B, T, D], out_features = 1.
    # Exercises token padding (16 -> 128) and the SMEM scalar-bias path.
    run_case(B=2, T=8, D=32, out_features=1, tm=512)
    # Multi-step grid (2 steps) + out_features > 1 (VMEM bias path), no padding.
    run_case(B=2, T=256, D=128, out_features=2, tm=256)

    # TODO(synk): the torch.distributions.Bernoulli object (sampling / log_prob
    # machinery) has no Pallas equivalent; the kernel returns its parameters
    # (logits, probs), which fully determine the distribution.
    print("KERNEL_OK")
</pallas_src>

<mosaic_0001>
module attributes {stable_mosaic.version = 11 : i64} {
  func.func @_bernoulli_gate_kernel(%arg0: i32, %arg1: memref<128x32xf32, #tpu.memory_space<vmem>>, %arg2: memref<8x32xf32, #tpu.memory_space<vmem>>, %arg3: memref<1xf32, #tpu.memory_space<smem>>, %arg4: memref<1x128xf32, #tpu.memory_space<vmem>>, %arg5: memref<1x128xf32, #tpu.memory_space<vmem>>) attributes {dimension_semantics = [#tpu.dimension_semantics<parallel>], iteration_bounds = array<i64: 1>, scalar_prefetch = 0 : i64, scratch_operands = 0 : i64, tpu.core_type = #tpu.core_type<tc>, window_params = [{transform_indices = @transform_0, window_bounds = array<i64: 128, 32>}, {pipeline_mode = #tpu.pipeline_mode<synchronous>, transform_indices = @transform_1, window_bounds = array<i64: 8, 32>}, {transform_indices = @transform_2, window_bounds = array<i64: 1>}, {transform_indices = @transform_3, window_bounds = array<i64: 1, 128>}, {transform_indices = @transform_4, window_bounds = array<i64: 1, 128>}]} {
    %c0 = arith.constant 0 : index
    %c0_0 = arith.constant 0 : index
    %0 = vector.load %arg2[%c0, %c0_0] : memref<8x32xf32, #tpu.memory_space<vmem>>, vector<8x32xf32>
    %c0_1 = arith.constant 0 : index
    %c0_2 = arith.constant 0 : index
    %1 = vector.load %arg1[%c0_1, %c0_2] : memref<128x32xf32, #tpu.memory_space<vmem>>, vector<128x32xf32>
    "tpu.trace_start"() <{level = 10 : i32, message = "od,td->ot"}> : () -> ()
    %cst = arith.constant dense<0.000000e+00> : vector<8x128xf32>
    %2 = tpu.matmul %0, %1, %cst {dimension_numbers = #tpu.dot_dimension_numbers<[1], [1], [0], [0], [0, 0, 1, 0], [], []>} : vector<8x32xf32>, vector<128x32xf32>, vector<8x128xf32> -> vector<8x128xf32>
    "tpu.trace_stop"() : () -> ()
    %3 = vector.extract_strided_slice %2 {offsets = [0, 0], sizes = [1, 128], strides = [1, 1]} : vector<8x128xf32> to vector<1x128xf32>
    %c0_3 = arith.constant 0 : index
    %4 = memref.load %arg3[%c0_3] : memref<1xf32, #tpu.memory_space<smem>>
    %5 = vector.broadcast %4 : f32 to vector<1x128xf32>
    %6 = arith.addf %3, %5 : vector<1x128xf32>
    %c0_4 = arith.constant 0 : index
    %c0_5 = arith.constant 0 : index
    %7 = vector.load %arg4[%c0_4, %c0_5] : memref<1x128xf32, #tpu.memory_space<vmem>>, vector<1x128xf32>
    tpu.vector_store %arg4[%c0_4, %c0_5], %6 {strides = array<i32>} : memref<1x128xf32, #tpu.memory_space<vmem>>, vector<1x128xf32>,
    %8 = arith.negf %6 : vector<1x128xf32>
    %9 = math.exp %8 : vector<1x128xf32>
    %cst_6 = arith.constant 1.000000e+00 : f32
    %10 = vector.broadcast %cst_6 : f32 to vector<1x128xf32>
    %11 = arith.addf %10, %9 : vector<1x128xf32>
    %12 = arith.divf %10, %11 : vector<1x128xf32>
    %c0_7 = arith.constant 0 : index
    %c0_8 = arith.constant 0 : index
    %13 = vector.load %arg5[%c0_7, %c0_8] : memref<1x128xf32, #tpu.memory_space<vmem>>, vector<1x128xf32>
    tpu.vector_store %arg5[%c0_7, %c0_8], %12 {strides = array<i32>} : memref<1x128xf32, #tpu.memory_space<vmem>>, vector<1x128xf32>,
    return
  }
  func.func @transform_0(%arg0: i32) -> (i32, i32) {
    %c0_i32 = arith.constant 0 : i32
    %c0_i32_0 = arith.constant 0 : i32
    return %arg0, %c0_i32 : i32, i32
  }
  func.func @transform_1(%arg0: i32) -> (i32, i32) {
    %c0_i32 = arith.constant 0 : i32
    %c0_i32_0 = arith.constant 0 : i32
    %c0_i32_1 = arith.constant 0 : i32
    return %c0_i32, %c0_i32_0 : i32, i32
  }
  func.func @transform_2(%arg0: i32) -> i32 {
    %c0_i32 = arith.constant 0 : i32
    %c0_i32_0 = arith.constant 0 : i32
    return %c0_i32 : i32
  }
  func.func @transform_3(%arg0: i32) -> (i32, i32) {
    %c0_i32 = arith.constant 0 : i32
    %c0_i32_0 = arith.constant 0 : i32
    return %c0_i32, %arg0 : i32, i32
  }
  func.func @transform_4(%arg0: i32) -> (i32, i32) {
    %c0_i32 = arith.constant 0 : i32
    %c0_i32_0 = arith.constant 0 : i32
    return %c0_i32, %arg0 : i32, i32
  }
}

</mosaic_0001>

<bundles_post_ra>
// kernel: bernoulli_gate.1
= control target key start
LH: loop header
LB: loop body
LE: loop exit
PB: predicated region body
PF: predicated region fallthrough
CT: control target
= control target key end

     0   :  { %vm34_vm0 = vcmask 261120   ;;  %v251_v0 = vmov 0.0   ;;  %vm252_vm1 = vmmov 0   ;;  %s355_s0 = inlined_call_operand.vmem [shape: f32[128,32], index: 0, kind: input, shape index: {}]   ;;  %s356_s1 = inlined_call_operand.vmem [shape: f32[8,32], index: 1, kind: input, shape index: {}]   ;;  %s357_s2 = inlined_call_operand.<no memory space> [shape: f32[1], index: 2, kind: input, shape index: {}]   ;;  %s358_s3 = inlined_call_operand.vmem [shape: f32[1,128], index: 3, kind: output, shape index: {0}]   ;;  %s359_s4 = inlined_call_operand.vmem [shape: f32[1,128], index: 4, kind: output, shape index: {1}]  }
   0x1   :  { %210 = vmatprep.subr.mxu0 %v251_v0  ;;  %v33_v1 = vld [vmem:[%s355_s0 + $0x78] sm:$0xff]  ;;  %242 = vmatprep.mubr.msk.f32.mxu0 %vm252_vm1, %v251_v0  ;;  %v32_v2 = vld [vmem:[%s355_s0 + $0x70] sm:$0xff]  ;;  %v31_v3 = vld [vmem:[%s355_s0 + $0x68] sm:$0xff]  ;;  %v157_v18 = vstv %s357_s2 }
   0x2   :  { %211 = vmatpush3.xpose.msk.msra.mxu0 %vm34_vm0, %v33_v1  ;;  %v30_v4 = vld [vmem:[%s355_s0 + $0x60] sm:$0xff]  ;;  %v29_v5 = vld [vmem:[%s355_s0 + $0x58] sm:$0xff]  ;;  %v28_v6 = vld [vmem:[%s355_s0 + $0x50] sm:$0xff] }
   0x3   :  { %212 = vmatprep.subr.mxu0 %v251_v0  ;;  %v27_v7 = vld [vmem:[%s355_s0 + $0x48] sm:$0xff]  ;;  %v26_v8 = vld [vmem:[%s355_s0 + $0x40] sm:$0xff]  ;;  %v25_v9 = vld [vmem:[%s355_s0 + $0x38] sm:$0xff] }
   0x4   :  { %v24_v10 = vld [vmem:[%s355_s0 + $0x30] sm:$0xff]  ;;  %v23_v11 = vld [vmem:[%s355_s0 + $0x28] sm:$0xff]  ;;  %v22_v12 = vld [vmem:[%s355_s0 + $0x20] sm:$0xff] }
   0x5   :  { %v21_v13 = vld [vmem:[%s355_s0 + $0x18] sm:$0xff]  ;;  %v20_v14 = vld [vmem:[%s355_s0 + $0x10] sm:$0xff]  ;;  %v19_v15 = vld [vmem:[%s355_s0 + $0x8] sm:$0xff] }
   0x6   :  { %213 = vmatpush3.xpose.msk.msra.mxu0 %vm34_vm0, %v32_v2  ;;  %v18_v16 = vld [vmem:[%s355_s0] sm:$0xff] }
   0x7   :  { %214 = vmatprep.subr.mxu0 %v251_v0  ;;  %v17_v17 = vld [vmem:[%s356_s1] sm:$0xff] }
   0xa   :  { %215 = vmatpush3.xpose.msk.msra.mxu0 %vm34_vm0, %v31_v3 }
   0xb   :  { %216 = vmatprep.subr.mxu0 %v251_v0 }
   0xe   :  { %217 = vmatpush3.xpose.msk.msra.mxu0 %vm34_vm0, %v30_v4 }
   0xf   :  { %218 = vmatprep.subr.mxu0 %v251_v0 }
  0x12   :  { %219 = vmatpush3.xpose.msk.msra.mxu0 %vm34_vm0, %v29_v5 }
  0x13   :  { %220 = vmatprep.subr.mxu0 %v251_v0 }
  0x16   :  { %221 = vmatpush3.xpose.msk.msra.mxu0 %vm34_vm0, %v28_v6 }
  0x17   :  { %222 = vmatprep.subr.mxu0 %v251_v0 }
  0x1a   :  { %223 = vmatpush3.xpose.msk.msra.mxu0 %vm34_vm0, %v27_v7 }
  0x1b   :  { %224 = vmatprep.subr.mxu0 %v251_v0 }
  0x1e   :  { %225 = vmatpush3.xpose.msk.msra.mxu0 %vm34_vm0, %v26_v8 }
  0x1f   :  { %226 = vmatprep.subr.mxu0 %v251_v0 }
  0x22   :  { %227 = vmatpush3.xpose.msk.msra.mxu0 %vm34_vm0, %v25_v9 }
  0x23   :  { %228 = vmatprep.subr.mxu0 %v251_v0 }
  0x26   :  { %229 = vmatpush3.xpose.msk.msra.mxu0 %vm34_vm0, %v24_v10 }
  0x27   :  { %230 = vmatprep.subr.mxu0 %v251_v0 }
  0x2a   :  { %231 = vmatpush3.xpose.msk.msra.mxu0 %vm34_vm0, %v23_v11 }
  0x2b   :  { %232 = vmatprep.subr.mxu0 %v251_v0 }
  0x2e   :  { %233 = vmatpush3.xpose.msk.msra.mxu0 %vm34_vm0, %v22_v12 }
  0x2f   :  { %234 = vmatprep.subr.mxu0 %v251_v0 }
  0x32   :  { %235 = vmatpush3.xpose.msk.msra.mxu0 %vm34_vm0, %v21_v13 }
  0x33   :  { %236 = vmatprep.subr.mxu0 %v251_v0 }
  0x36   :  { %237 = vmatpush3.xpose.msk.msra.mxu0 %vm34_vm0, %v20_v14 }
  0x37   :  { %238 = vmatprep.subr.mxu0 %v251_v0 }
  0x3a   :  { %239 = vmatpush3.xpose.msk.msra.mxu0 %vm34_vm0, %v19_v15 }
  0x3b   :  { %240 = vmatprep.subr.mxu0 %v251_v0 }
  0x3e   :  { %241 = vmatpush3.xpose.msk.msra.mxu0 %vm34_vm0, %v18_v16 }
  0x41   :  { %243 = vmatmul.mubr.msk.f32.vlgmr.msra.gmra.mxu0 %vm34_vm0, %v17_v17 }
 0x101   :  { %v152_v19 = vpop.f32.mrf.mxu0 }
 0x102   :  { %v158_v20 = vadd.f32 %v157_v18, %v152_v19 }
 0x103   :  { %v244_v21 = vpop.f32.mrf.mxu0 }
 0x104   :  { %159 = vst [vmem:[%s358_s3] sm:$0x1] %v158_v20  ;;  %v192_v22 = vmul.f32 -1.442695, %v158_v20 }
 0x106   :  { %247 = vpow2.f32 %v192_v22 }
 0x113   :  { %v248_v23 = vpop.eup %247 }
 0x114   :  { %v163_v24 = vadd.f32 1.0, %v248_v23 }
 0x116   :  { %249 = vrcp.f32 %v163_v24 }
 0x123   :  { %v250_v25 = vpop.eup %249 }
 0x124   :  { %166 = vst [vmem:[%s359_s4] sm:$0x1] %v250_v25 }

</bundles_post_ra>
